<compile_context>
chip_gen: v7x
topology: tpu7x:2x2x1
jax: 0.10.0
libtpu: 0.0.40
codegen_flags: <defaults>
</compile_context>

<pallas_src>
import functools
import math

import jax
import jax.numpy as jnp
from jax.experimental import pallas as pl
from jax.experimental.pallas import tpu as pltpu


# Large finite negative instead of -inf (robust if ever extended to padding /
# segment masks where a whole row could be masked).
_MASK_VALUE = -0.7 * float(jnp.finfo(jnp.float32).max)


def _round_up(x, m):
    return (x + m - 1) // m * m


# -----------------------------------------------------------------------------
# Kernel 1: fused Q/K/V projection (hoisted out of the attention kernel).
# -----------------------------------------------------------------------------
def _qkv_proj_kernel(x_ref, wq_ref, wk_ref, wv_ref, q_ref, k_ref, v_ref):
    xt = x_ref[0]                                              # (blk, d_in)
    q_ref[0] = jnp.dot(xt, wq_ref[...],
                       preferred_element_type=jnp.float32).astype(q_ref.dtype)
    k_ref[0] = jnp.dot(xt, wk_ref[...],
                       preferred_element_type=jnp.float32).astype(k_ref.dtype)
    v_ref[0] = jnp.dot(xt, wv_ref[...],
                       preferred_element_type=jnp.float32).astype(v_ref.dtype)


def _qkv_projection(x, wq_scaled, wk, wv, *, blk, out_dtype):
    """x: (B, t_pad, d_in) -> q, k, v each (B, t_pad, d_out) in out_dtype."""
    B, t_pad, d_in = x.shape
    d_out = wk.shape[1]
    n_t = t_pad // blk
    shape = jax.ShapeDtypeStruct((B, t_pad, d_out), out_dtype)
    w_spec = pl.BlockSpec((d_in, d_out), lambda b, i: (0, 0))
    o_spec = pl.BlockSpec((1, blk, d_out), lambda b, i: (b, i, 0))
    return pl.pallas_call(
        _qkv_proj_kernel,
        out_shape=(shape, shape, shape),
        grid_spec=pltpu.PrefetchScalarGridSpec(
            num_scalar_prefetch=0,
            grid=(B, n_t),
            in_specs=[
                pl.BlockSpec((1, blk, d_in), lambda b, i: (b, i, 0)),
                w_spec, w_spec, w_spec,
            ],
            out_specs=[o_spec, o_spec, o_spec],
        ),
        compiler_params=pltpu.CompilerParams(
            dimension_semantics=("parallel", "parallel")),
    )(x, wq_scaled, wk, wv)


# -----------------------------------------------------------------------------
# Kernel 2: causal flash attention over a triangular (qi, kvi) schedule,
# with out_proj (+bias) fused into the finalize step.
# -----------------------------------------------------------------------------
def _flash_attn_kernel(qi_tab_ref, kvi_tab_ref,                # scalar prefetch
                       q_ref, k_ref, v_ref, wo_ref, bo_ref,    # inputs
                       o_ref,                                  # output
                       m_scr, l_scr, acc_scr,                  # scratch
                       *, num_heads, head_dim, mxu_dtype):
    step = pl.program_id(1)
    qi = qi_tab_ref[step]
    kvi = kvi_tab_ref[step]

    @pl.when(kvi == 0)
    def _init():
        m_scr[...] = jnp.full_like(m_scr, _MASK_VALUE)
        l_scr[...] = jnp.zeros_like(l_scr)
        acc_scr[...] = jnp.zeros_like(acc_scr)

    def _attend(diagonal):
        q = q_ref[0]                    # (blk, d_out), mxu_dtype, pre-scaled
        k = k_ref[0]                    # (blk, d_out)
        v = v_ref[0]                    # (blk, d_out)
        acc_prev = acc_scr[...]         # (blk, d_out)  f32
        m_prev_all = m_scr[...]         # (blk, num_heads) f32
        l_prev_all = l_scr[...]         # (blk, num_heads) f32
        if diagonal:
            # Built once per diagonal tile, reused by every head.  With equal
            # q/kv tile sizes the global condition (col > row) equals the
            # local one on the diagonal tile.
            row = jax.lax.broadcasted_iota(jnp.int32, (q.shape[0], k.shape[0]), 0)
            col = jax.lax.broadcasted_iota(jnp.int32, (q.shape[0], k.shape[0]), 1)
            above = col > row
        m_cols, l_cols, acc_cols = [], [], []
        for h in range(num_heads):
            sl = slice(h * head_dim, (h + 1) * head_dim)
            # scores = q_h @ k_h.T without materializing a transpose.
            s = jax.lax.dot_general(
                q[:, sl], k[:, sl], (((1,), (1,)), ((), ())),
                preferred_element_type=jnp.float32)
            if diagonal:
                s = jnp.where(above, _MASK_VALUE, s)
            m_prev = m_prev_all[:, h:h + 1]
            m_new = jnp.maximum(m_prev, jnp.max(s, axis=-1, keepdims=True))
            alpha = jnp.exp(m_prev - m_new)
            # NOTE: on v6e/v7x p can be computed in bf16 for EUP throughput;
            # kept f32 here for accuracy (and v5e has no bf16 EUP).
            p = jnp.exp(s - m_new)
            l_cols.append(alpha * l_prev_all[:, h:h + 1]
                          + jnp.sum(p, axis=-1, keepdims=True))
            acc_cols.append(alpha * acc_prev[:, sl]
                            + jnp.dot(p.astype(mxu_dtype), v[:, sl],
                                      preferred_element_type=jnp.float32))
            m_cols.append(m_new)
        # Single lane-dense write per scratch per step.
        m_scr[...] = jnp.concatenate(m_cols, axis=-1)
        l_scr[...] = jnp.concatenate(l_cols, axis=-1)
        acc_scr[...] = jnp.concatenate(acc_cols, axis=-1)

    @pl.when(kvi < qi)
    def _off_diagonal():
        _attend(diagonal=False)

    @pl.when(kvi == qi)
    def _diagonal_and_finalize():
        _attend(diagonal=True)
        # Finalize: normalize per head (exact division; runs once per q-tile),
        # then one full-depth (blk, d_out) @ (d_out, d_out) MXU op for
        # out_proj, plus bias.  Output is already lane-dense (blk, d_out).
        acc = acc_scr[...]
        l_all = l_scr[...]
        inv_cols = [jnp.broadcast_to(1.0 / l_all[:, h:h + 1],
                                     (acc.shape[0], head_dim))
                    for h in range(num_heads)]
        inv = jnp.concatenate(inv_cols, axis=-1)               # (blk, d_out)
        ctx = (acc * inv).astype(mxu_dtype)
        out = jnp.dot(ctx, wo_ref[...], preferred_element_type=jnp.float32)
        # TODO(synk): nn.Dropout on attn_weights is identity in eval mode;
        # training-mode stochastic dropout is not reproduced here.
        o_ref[0] = (out + bo_ref[...]).astype(o_ref.dtype)


def multi_head_attention(x, wq, wk, wv, wo, bo, *, num_heads,
                         block_size=128, mxu_dtype=None):
    """x: (B, T, d_in); wq/wk/wv: (d_in, d_out); wo: (d_out, d_out); bo: (d_out,).

    Returns (B, T, d_out), matching MultiHeadAttention.forward in eval mode.
    On v6e/v7x pass mxu_dtype=jnp.bfloat16 (and block_size=256) for full MXU
    rate and half the VMEM/HBM traffic; accumulation and softmax stay f32.
    """
    B, T, d_in = x.shape
    d_out = wq.shape[1]
    assert d_out % num_heads == 0, "d_out must be divisible by num_heads"
    head_dim = d_out // num_heads
    scale = 1.0 / math.sqrt(head_dim)
    if mxu_dtype is None:
        mxu_dtype = x.dtype

    # q/kv tile: divides the padded sequence, respects the (8,128) constraint.
    # Zero-padded keys sit at positions >= T which real queries always mask
    # causally; padded query rows are sliced off at the end.
    blk = min(block_size, _round_up(T, 8))
    t_pad = _round_up(T, blk)
    x_p = jnp.pad(x, ((0, 0), (0, t_pad - T), (0, 0))) if t_pad != T else x
    n_t = t_pad // blk

    # Pre-cast / pre-scale once in the wrapper (no per-step casts in kernels);
    # softmax scale folded into the Q projection weight.
    wq_s = (wq * scale).astype(mxu_dtype)
    wk_c = wk.astype(mxu_dtype)
    wv_c = wv.astype(mxu_dtype)
    wo_c = wo.astype(mxu_dtype)
    bo2 = bo.reshape(1, d_out).astype(jnp.float32)
    x_c = x_p.astype(mxu_dtype)

    # Projections hoisted: K/V computed exactly once per token.
    q, k, v = _qkv_projection(x_c, wq_s, wk_c, wv_c, blk=blk,
                              out_dtype=mxu_dtype)

    # Triangular schedule: visit only (qi, kvi) with kvi <= qi.
    qi_list, kvi_list = [], []
    for qi_ in range(n_t):
        for kvi_ in range(qi_ + 1):
            qi_list.append(qi_)
            kvi_list.append(kvi_)
    qi_tab = jnp.asarray(qi_list, dtype=jnp.int32)
    kvi_tab = jnp.asarray(kvi_list, dtype=jnp.int32)
    n_steps = int(qi_tab.shape[0])

    kernel = functools.partial(_flash_attn_kernel, num_heads=num_heads,
                               head_dim=head_dim, mxu_dtype=mxu_dtype)

    elem = jnp.dtype(mxu_dtype).itemsize
    attn_flops = 2 * 2 * B * n_steps * blk * blk * d_out       # qk^T + pv
    outp_flops = 2 * B * t_pad * d_out * d_out                 # fused out_proj
    cost = pl.CostEstimate(
        flops=int(attn_flops + outp_flops),
        transcendentals=int(B * n_steps * num_heads * blk * blk),
        bytes_accessed=int(
            elem * (B * t_pad * d_out                          # q (once/tile)
                    + 2 * B * n_steps * blk * d_out            # k, v per step
                    + wo.size)
            + 4 * bo.size
            + jnp.dtype(x.dtype).itemsize * B * t_pad * d_out))  # output

    out = pl.pallas_call(
        kernel,
        out_shape=jax.ShapeDtypeStruct((B, t_pad, d_out), x.dtype),
        grid_spec=pltpu.PrefetchScalarGridSpec(
            num_scalar_prefetch=2,
            grid=(B, n_steps),                   # reduction (kv walk) axis last
            in_specs=[
                pl.BlockSpec((1, blk, d_out), lambda b, s, qt, kt: (b, qt[s], 0)),
                pl.BlockSpec((1, blk, d_out), lambda b, s, qt, kt: (b, kt[s], 0)),
                pl.BlockSpec((1, blk, d_out), lambda b, s, qt, kt: (b, kt[s], 0)),
                pl.BlockSpec((d_out, d_out), lambda b, s, qt, kt: (0, 0)),
                pl.BlockSpec((1, d_out), lambda b, s, qt, kt: (0, 0)),
            ],
            # Lane-dense output (B, T, num_heads*head_dim) written directly.
            out_specs=pl.BlockSpec((1, blk, d_out),
                                   lambda b, s, qt, kt: (b, qt[s], 0)),
            scratch_shapes=[
                pltpu.VMEM((blk, num_heads), jnp.float32),   # running max
                pltpu.VMEM((blk, num_heads), jnp.float32),   # running sum
                pltpu.VMEM((blk, d_out), jnp.float32),       # lane-dense acc
            ],
        ),
        compiler_params=pltpu.CompilerParams(
            # batch axis shards across TensorCores; the triangular step axis
            # carries the online-softmax state -> "arbitrary".
            dimension_semantics=("parallel", "arbitrary")),
        cost_estimate=cost,
    )(qi_tab, kvi_tab, q, k, v, wo_c, bo2)

    return out[:, :T, :]


def _reference(x, wq, wk, wv, wo, bo, num_heads):
    """Pure-JAX replica of MultiHeadAttention.forward (eval mode)."""
    B, T, _ = x.shape
    d_out = wq.shape[1]
    hd = d_out // num_heads
    q = (x @ wq).reshape(B, T, num_heads, hd).transpose(0, 2, 1, 3)
    k = (x @ wk).reshape(B, T, num_heads, hd).transpose(0, 2, 1, 3)
    v = (x @ wv).reshape(B, T, num_heads, hd).transpose(0, 2, 1, 3)
    scores = q @ jnp.swapaxes(k, -1, -2)
    mask = jnp.triu(jnp.ones((T, T), dtype=bool), k=1)
    scores = jnp.where(mask[None, None], -jnp.inf, scores)
    w = jax.nn.softmax(scores / math.sqrt(hd), axis=-1)
    ctx = (w @ v).transpose(0, 2, 1, 3).reshape(B, T, d_out)
    return ctx @ wo + bo


if __name__ == "__main__":
    # Shapes from the chapter: the 6x3 `inputs` tensor stacked twice ->
    # (B=2, T=6, d_in=3); d_out=4 with num_heads=2 (head_dim=2).
    inputs = jnp.array(
        [[0.43, 0.15, 0.89],
         [0.55, 0.87, 0.66],
         [0.57, 0.85, 0.64],
         [0.22, 0.58, 0.33],
         [0.77, 0.25, 0.10],
         [0.05, 0.80, 0.55]], dtype=jnp.float32)
    x = jnp.stack([inputs, inputs], axis=0)

    d_in, d_out, num_heads = 3, 4, 2

    key = jax.random.PRNGKey(0)
    kq, kk, kv_key, ko, kb = jax.random.split(key, 5)
    # Stand-ins for nn.Linear weights (qkv_bias=False; out_proj has a bias).
    wq = jax.random.uniform(kq, (d_in, d_out), dtype=jnp.float32)
    wk = jax.random.uniform(kk, (d_in, d_out), dtype=jnp.float32)
    wv = jax.random.uniform(kv_key, (d_in, d_out), dtype=jnp.float32)
    wo = jax.random.uniform(ko, (d_out, d_out), dtype=jnp.float32)
    bo = jax.random.uniform(kb, (d_out,), dtype=jnp.float32)

    out = multi_head_attention(x, wq, wk, wv, wo, bo, num_heads=num_heads)
    out = jax.block_until_ready(out)

    ref = _reference(x, wq, wk, wv, wo, bo, num_heads)
    assert out.shape == ref.shape == (2, 6, d_out)
    # Tolerance covers default TPU MXU precision for f32 operands.
    assert jnp.allclose(out, ref, atol=2e-3, rtol=2e-3), (
        float(jnp.max(jnp.abs(out - ref))))

    print("KERNEL_OK")
</pallas_src>

<mosaic_0001>
module attributes {stable_mosaic.version = 11 : i64} {
  func.func @_qkv_proj_kernel(%arg0: i32, %arg1: i32, %arg2: memref<1x8x3xf32, #tpu.memory_space<vmem>>, %arg3: memref<3x4xf32, #tpu.memory_space<vmem>>, %arg4: memref<3x4xf32, #tpu.memory_space<vmem>>, %arg5: memref<3x4xf32, #tpu.memory_space<vmem>>, %arg6: memref<1x8x4xf32, #tpu.memory_space<vmem>>, %arg7: memref<1x8x4xf32, #tpu.memory_space<vmem>>, %arg8: memref<1x8x4xf32, #tpu.memory_space<vmem>>) attributes {dimension_semantics = [#tpu.dimension_semantics<parallel>, #tpu.dimension_semantics<parallel>], iteration_bounds = array<i64: 2, 1>, scalar_prefetch = 0 : i64, scratch_operands = 0 : i64, tpu.core_type = #tpu.core_type<tc>, window_params = [{transform_indices = @transform_0, window_bounds = array<i64: 1, 8, 3>}, {pipeline_mode = #tpu.pipeline_mode<synchronous>, transform_indices = @transform_1, window_bounds = array<i64: 3, 4>}, {pipeline_mode = #tpu.pipeline_mode<synchronous>, transform_indices = @transform_2, window_bounds = array<i64: 3, 4>}, {pipeline_mode = #tpu.pipeline_mode<synchronous>, transform_indices = @transform_3, window_bounds = array<i64: 3, 4>}, {transform_indices = @transform_4, window_bounds = array<i64: 1, 8, 4>}, {transform_indices = @transform_5, window_bounds = array<i64: 1, 8, 4>}, {transform_indices = @transform_6, window_bounds = array<i64: 1, 8, 4>}]} {
    %c0 = arith.constant 0 : index
    %c0_0 = arith.constant 0 : index
    %c0_1 = arith.constant 0 : index
    %0 = vector.load %arg2[%c0, %c0_0, %c0_1] : memref<1x8x3xf32, #tpu.memory_space<vmem>>, vector<1x8x3xf32>
    %1 = vector.shape_cast %0 : vector<1x8x3xf32> to vector<8x3xf32>
    %c0_2 = arith.constant 0 : index
    %c0_3 = arith.constant 0 : index
    %2 = vector.load %arg3[%c0_2, %c0_3] : memref<3x4xf32, #tpu.memory_space<vmem>>, vector<3x4xf32>
    %cst = arith.constant dense<0.000000e+00> : vector<8x4xf32>
    %3 = tpu.matmul %1, %2, %cst {dimension_numbers = #tpu.dot_dimension_numbers<[1], [0], [0], [1], [0, 0, 1, 1], [], []>} : vector<8x3xf32>, vector<3x4xf32>, vector<8x4xf32> -> vector<8x4xf32>
    %c0_4 = arith.constant 0 : index
    %c0_5 = arith.constant 0 : index
    %c0_6 = arith.constant 0 : index
    %4 = vector.load %arg6[%c0_4, %c0_5, %c0_6] : memref<1x8x4xf32, #tpu.memory_space<vmem>>, vector<1x8x4xf32>
    %5 = vector.shape_cast %4 : vector<1x8x4xf32> to vector<8x4xf32>
    %6 = vector.shape_cast %3 : vector<8x4xf32> to vector<1x8x4xf32>
    tpu.vector_store %arg6[%c0_4, %c0_5, %c0_6], %6 {strides = array<i32>} : memref<1x8x4xf32, #tpu.memory_space<vmem>>, vector<1x8x4xf32>,
    %c0_7 = arith.constant 0 : index
    %c0_8 = arith.constant 0 : index
    %7 = vector.load %arg4[%c0_7, %c0_8] : memref<3x4xf32, #tpu.memory_space<vmem>>, vector<3x4xf32>
    %cst_9 = arith.constant dense<0.000000e+00> : vector<8x4xf32>
    %8 = tpu.matmul %1, %7, %cst_9 {dimension_numbers = #tpu.dot_dimension_numbers<[1], [0], [0], [1], [0, 0, 1, 1], [], []>} : vector<8x3xf32>, vector<3x4xf32>, vector<8x4xf32> -> vector<8x4xf32>
    %c0_10 = arith.constant 0 : index
    %c0_11 = arith.constant 0 : index
    %c0_12 = arith.constant 0 : index
    %9 = vector.load %arg7[%c0_10, %c0_11, %c0_12] : memref<1x8x4xf32, #tpu.memory_space<vmem>>, vector<1x8x4xf32>
    %10 = vector.shape_cast %9 : vector<1x8x4xf32> to vector<8x4xf32>
    %11 = vector.shape_cast %8 : vector<8x4xf32> to vector<1x8x4xf32>
    tpu.vector_store %arg7[%c0_10, %c0_11, %c0_12], %11 {strides = array<i32>} : memref<1x8x4xf32, #tpu.memory_space<vmem>>, vector<1x8x4xf32>,
    %c0_13 = arith.constant 0 : index
    %c0_14 = arith.constant 0 : index
    %12 = vector.load %arg5[%c0_13, %c0_14] : memref<3x4xf32, #tpu.memory_space<vmem>>, vector<3x4xf32>
    %cst_15 = arith.constant dense<0.000000e+00> : vector<8x4xf32>
    %13 = tpu.matmul %1, %12, %cst_15 {dimension_numbers = #tpu.dot_dimension_numbers<[1], [0], [0], [1], [0, 0, 1, 1], [], []>} : vector<8x3xf32>, vector<3x4xf32>, vector<8x4xf32> -> vector<8x4xf32>
    %c0_16 = arith.constant 0 : index
    %c0_17 = arith.constant 0 : index
    %c0_18 = arith.constant 0 : index
    %14 = vector.load %arg8[%c0_16, %c0_17, %c0_18] : memref<1x8x4xf32, #tpu.memory_space<vmem>>, vector<1x8x4xf32>
    %15 = vector.shape_cast %14 : vector<1x8x4xf32> to vector<8x4xf32>
    %16 = vector.shape_cast %13 : vector<8x4xf32> to vector<1x8x4xf32>
    tpu.vector_store %arg8[%c0_16, %c0_17, %c0_18], %16 {strides = array<i32>} : memref<1x8x4xf32, #tpu.memory_space<vmem>>, vector<1x8x4xf32>,
    return
  }
  func.func @transform_0(%arg0: i32, %arg1: i32) -> (i32, i32, i32) {
    %c0_i32 = arith.constant 0 : i32
    %c0_i32_0 = arith.constant 0 : i32
    return %arg0, %arg1, %c0_i32 : i32, i32, i32
  }
  func.func @transform_1(%arg0: i32, %arg1: i32) -> (i32, i32) {
    %c0_i32 = arith.constant 0 : i32
    %c0_i32_0 = arith.constant 0 : i32
    %c0_i32_1 = arith.constant 0 : i32
    return %c0_i32, %c0_i32_0 : i32, i32
  }
  func.func @transform_2(%arg0: i32, %arg1: i32) -> (i32, i32) {
    %c0_i32 = arith.constant 0 : i32
    %c0_i32_0 = arith.constant 0 : i32
    %c0_i32_1 = arith.constant 0 : i32
    return %c0_i32, %c0_i32_0 : i32, i32
  }
  func.func @transform_3(%arg0: i32, %arg1: i32) -> (i32, i32) {
    %c0_i32 = arith.constant 0 : i32
    %c0_i32_0 = arith.constant 0 : i32
    %c0_i32_1 = arith.constant 0 : i32
    return %c0_i32, %c0_i32_0 : i32, i32
  }
  func.func @transform_4(%arg0: i32, %arg1: i32) -> (i32, i32, i32) {
    %c0_i32 = arith.constant 0 : i32
    %c0_i32_0 = arith.constant 0 : i32
    return %arg0, %arg1, %c0_i32 : i32, i32, i32
  }
  func.func @transform_5(%arg0: i32, %arg1: i32) -> (i32, i32, i32) {
    %c0_i32 = arith.constant 0 : i32
    %c0_i32_0 = arith.constant 0 : i32
    return %arg0, %arg1, %c0_i32 : i32, i32, i32
  }
  func.func @transform_6(%arg0: i32, %arg1: i32) -> (i32, i32, i32) {
    %c0_i32 = arith.constant 0 : i32
    %c0_i32_0 = arith.constant 0 : i32
    return %arg0, %arg1, %c0_i32 : i32, i32, i32
  }
}

</mosaic_0001>

<bundles_post_ra>
// kernel: tpu_custom_call.1
= control target key start
LH: loop header
LB: loop body
LE: loop exit
PB: predicated region body
PF: predicated region fallthrough
CT: control target
= control target key end

     0   :  { %s828_s21 = smov 0   ;;  %s830_s22 = smov 0   ;;  %s882_s0 = inlined_call_operand.vmem [shape: f32[2,8,3], index: 0, kind: input, shape index: {}]   ;;  %s883_s1 = inlined_call_operand.vmem [shape: f32[3,4], index: 1, kind: input, shape index: {}]   ;;  %s884_s2 = inlined_call_operand.vmem [shape: f32[3,4], index: 2, kind: input, shape index: {}]   ;;  %s885_s3 = inlined_call_operand.vmem [shape: f32[3,4], index: 3, kind: input, shape index: {}]   ;;  %s886_s4 = inlined_call_operand.vmem [shape: f32[2,8,4], index: 4, kind: output, shape index: {0}]   ;;  %s887_s5 = inlined_call_operand.vmem [shape: f32[2,8,4], index: 5, kind: output, shape index: {1}]   ;;  %s888_s6 = inlined_call_operand.vmem [shape: f32[2,8,4], index: 6, kind: output, shape index: {2}]  }
   0x1   :  { %s832_s23 = smov 0  }
   0x2 LB: > { %s29_s24 = sadd.s32 1, %s785_s22  ;;  %p707_p0 = scmp.ge.s32.totalorder %s789_s23, 1  ;;  %s789_s23 = sphi %s832_s23, %s17_s23   ;;  %s785_s22 = sphi %s830_s22, %s890_s22   ;;  %s781_s21 = sphi %s828_s21, %s889_s21  }
   0x3   : > { %p31_p1 = scmp.ge.s32.totalorder %s29_s24, 2  ;;  %p239_p2 = scmp.lt.s32.totalorder %s789_s23, 3 }
   0x5   : > { %s892_s24 = smov (%p31_p1, %s29_s24), 0  ;;  %p240_p3 = pnand %p707_p0, %p239_p2 }
   0x6   : > { %v316_v0 = vld [vmem:[%s883_s1] sm:$0x7] (!%p240_p3)  ;;  %vm321_vm0 = vcmask (!%p240_p3), 1042432   ;;  %p287_p4 = scmp.lt.s32.totalorder (!%p240_p3), %s781_s21, 1  ;;  %v791_v1 = vmov (!%p240_p3), 0.0   ;;  %vm792_vm1 = vmmov (!%p240_p3), 0  }
   0x7   : > { %243 = sbr.rel (%p240_p3) target bundleno = 235 (0xeb), region = 36  ;;  %726 = vmatprep.subr.mxu0 (!%p240_p3), %v791_v1  ;;  %728 = vmatprep.mubr.msk.f32.mxu0 (!%p240_p3), %vm792_vm1, %v791_v1  ;;  %v397_v2 = vld [vmem:[%s884_s2] sm:$0x7] (!%p240_p3)  ;;  %vm317_vm2 = vcmask (!%p240_p3), 23552   ;;  %vm395_vm3 = vcmask (!%p240_p3), 31744  }
   0x8   : > { %727 = vmatpush3.msk.msra.mxu0 (!%p240_p3), %vm321_vm0, %v316_v0  ;;  %731 = vmatprep.subr.mxu1 (!%p240_p3), %v791_v1  ;;  %v472_v3 = vld [vmem:[%s885_s3] sm:$0x7] (!%p240_p3) }
   0x9   : > { %736 = vmatprep.subr.mxu0 (!%p240_p3), %v791_v1  ;;  %732 = vmatpush3.msk.msra.mxu1 (!%p240_p3), %vm321_vm0, %v397_v2 }
   0xa   : > { %733 = vmatprep.mubr.msk.f32.mxu1 (!%p240_p3), %vm792_vm1, %v791_v1 }
   0xe   : > { %s894_s21 = smov (!%p287_p4, %s781_s21), 1 }
   0xf   : > { %s708_s29 = sshll.u32 %s894_s21, 3 }
  0x10   : > { %s293_s8 = scalar_lea.vmem %s882_s0, %s708_s29  ;;  %s300_s13 = scalar_lea.vmem %s886_s4, %s708_s29 }
  0x11   : > { %v315_v4 = vld [vmem:[%s293_s8] sm:$0xff]  ;;  %s307_s16 = scalar_lea.vmem %s887_s5, %s708_s29  ;;  %s314_s19 = scalar_lea.vmem %s888_s6, %s708_s29 }
  0x12   : > { %729 = vmatmul.mubr.msk.f32.vlgmr.msra.gmra.mrb[0].mxu0 %vm317_vm2, %v315_v4  ;;  %734 = vmatmul.mubr.msk.f32.vlgmr.msra.gmra.mrb[0].mxu1 %vm317_vm2, %v315_v4 }
  0x13   : > { %737 = vmatpush3.msk.msra.mxu0 %vm321_vm0, %v472_v3  ;;  %738 = vmatprep.mubr.msk.f32.mxu0 %vm792_vm1, %v791_v1 }
  0x16   : > { %739 = vmatmul.mubr.msk.f32.vlgmr.msra.gmra.mrb[2].mxu0 %vm317_vm2, %v315_v4 }
  0xe5   : > { %v391_v5 = vpop.f32.mrb[0].mxu0  ;;  %v467_v6 = vpop.f32.mrb[0].mxu1 }
  0xe6   : > { %396 = vst.msk [vmem:[%s300_s13] sm:$0xff] %vm395_vm3, %v391_v5  ;;  %v730_v7 = vpop.f32.mrb[1].mxu0  ;;  %471 = vst.msk [vmem:[%s307_s16] sm:$0xff] %vm395_vm3, %v467_v6  ;;  %v735_v8 = vpop.f32.mrb[1].mxu1 }
  0xe9   : > { %v542_v9 = vpop.f32.mrb[2].mxu0 }
  0xea   : > { %546 = vst.msk [vmem:[%s314_s19] sm:$0xff] %vm395_vm3, %v542_v9  ;;  %v740_v10 = vpop.f32.mrb[3].mxu0 }
  0xeb PF: > { %s17_s23 = sadd.s32 1, %s789_s23   ;;  %s889_s21 = smov %s785_s22 }
  0xec   : > { %p14_p5 = scmp.ge.s32.totalorder %s17_s23, 4   ;;  %s890_s22 = smov %s892_s24 }
  0xee   :  { %16 = sbr.rel (!%p14_p5) target bundleno = 2 (0x2), region = 90 }

</bundles_post_ra>
